<compile_context>
chip_gen: v6e
topology: v6e:2x2x1
jax: 0.10.0
libtpu: 0.0.40
codegen_flags: <defaults>
</compile_context>

<pallas_src>
import numpy as np
import jax
import jax.numpy as jnp
from jax.experimental import pallas as pl
from jax.experimental.pallas import tpu as pltpu


def _round_up(x: int, m: int) -> int:
    return ((x + m - 1) // m) * m


def _cdiv(a: int, b: int) -> int:
    return (a + b - 1) // b


# ----------------------------- Pallas kernel -------------------------------

def _cost_kernel(params_ref, logits_ref, points_ref, onehot_ref, tgt_pts_ref,
                 out_ref):
    # params_ref  (4,)      f32 SMEM  [img_h*|wp|, img_w*|wp|, w_class, sign(wp)]
    # logits_ref  (bn, C)   f32 VMEM  query logits
    # points_ref  (bn, 2)   f32 VMEM  normalized predicted points
    # onehot_ref  (C, Tp)   f32 VMEM  per-sample one-hot of target labels
    # tgt_pts_ref (2, Tp)   f32 VMEM  per-sample target points (pre-scaled by |wp|)
    # out_ref     (bn, Tp)  f32 VMEM  cost tile (lane-dense)
    py = params_ref[0]
    px = params_ref[1]
    w_class = params_ref[2]
    wp_sign = params_ref[3]

    # class cost: -w_class * softmax(logits)[:, tgt_ids] via one-hot matmul on
    # the MXU; softmax normalization deferred past the matmul (one exact
    # per-row reciprocal folded into the (bn,1) scale).
    logits = logits_ref[...]
    m = jnp.max(logits, axis=-1, keepdims=True)
    e = jnp.exp(logits - m)                                       # (bn, C)
    denom = jnp.sum(e, axis=-1, keepdims=True)                    # (bn, 1)
    u = jnp.dot(e, onehot_ref[...], preferred_element_type=jnp.float32)
    cls = (-(w_class * pl.reciprocal(denom))) * u                 # (bn, Tp)

    # point cost: |w_point| * cdist(points * [img_h, img_w], tgt_points, p=2)
    # (|w_point| folded into py/px on device and into tgt_pts on host).
    pts = points_ref[...]                                         # (bn, 2)
    tgt = tgt_pts_ref[...]                                        # (2, Tp)
    d0 = pts[:, 0:1] * py - tgt[0:1, :]
    d1 = pts[:, 1:2] * px - tgt[1:2, :]
    cp = jnp.sqrt(d0 * d0 + d1 * d1)                              # (bn, Tp)

    @pl.when(wp_sign >= 0.0)
    def _():
        out_ref[...] = cp + cls

    @pl.when(wp_sign < 0.0)
    def _():
        out_ref[...] = cls - cp


def _pick_block_n(nq: int, num_classes: int, t_pad: int, bs: int) -> int:
    # ~20 MiB double-buffered budget: safe on v5e (16 MiB default scoped VMEM,
    # raised via vmem_limit_bytes), v6e (32 MiB default) and v7x (64 MiB phys).
    budget = 20 << 20
    fixed = 2 * 4 * (num_classes + 2) * t_pad            # one-hot + tgt points
    per_row = 2 * 4 * (t_pad + num_classes + 2)          # out + logits + points
    max_rows = max((budget - fixed) // per_row, 8)
    bn = min(nq, 2048, int(max_rows))
    # v7x megacore: when bs == 1, make sure the grid still has >= 2 steps.
    if bs == 1 and nq >= 16:
        bn = min(bn, _round_up(_cdiv(nq, 2), 8))
    if bn >= nq:
        return nq                                        # full dim: always legal
    return max(8, (bn // 8) * 8)                         # else multiple of 8


@jax.jit
def _cost_blocks_jit(params, logits, points, tgt_ids_pad, tgt_pts_pad):
    """(4,), (bs,nq,C), (bs,nq,2), (bs,Tp) i32, (bs,2,Tp) -> (bs,nq,Tp) f32."""
    bs, nq, num_classes = logits.shape
    t_pad = tgt_ids_pad.shape[-1]

    logits = logits.astype(jnp.float32)
    points = points.astype(jnp.float32)
    tgt_pts_pad = tgt_pts_pad.astype(jnp.float32)

    # (bs, C, Tp) one-hot gather matrix (padded ids are -1 -> all-zero column).
    onehot = (tgt_ids_pad[:, None, :] ==
              jnp.arange(num_classes, dtype=jnp.int32)[None, :, None]
              ).astype(jnp.float32)

    block_n = _pick_block_n(nq, int(num_classes), int(t_pad), int(bs))
    grid = (bs, _cdiv(nq, block_n))

    vmem_bytes = (2 * 4 * (block_n * (t_pad + num_classes + 2)
                           + (num_classes + 2) * t_pad) + (2 << 20))
    vmem_limit = int(min(max(vmem_bytes, 16 << 20), 40 << 20))

    return pl.pallas_call(
        _cost_kernel,
        out_shape=jax.ShapeDtypeStruct((bs, nq, t_pad), jnp.float32),
        grid=grid,
        in_specs=[
            pl.BlockSpec(memory_space=pltpu.MemorySpace.SMEM),            # params
            pl.BlockSpec((None, block_n, num_classes), lambda b, i: (b, i, 0)),
            pl.BlockSpec((None, block_n, 2), lambda b, i: (b, i, 0)),
            pl.BlockSpec((None, num_classes, t_pad), lambda b, i: (b, 0, 0)),
            pl.BlockSpec((None, 2, t_pad), lambda b, i: (b, 0, 0)),
        ],
        out_specs=pl.BlockSpec((None, block_n, t_pad), lambda b, i: (b, i, 0)),
        compiler_params=pltpu.CompilerParams(
            dimension_semantics=("parallel", "parallel"),
            vmem_limit_bytes=vmem_limit),
    )(params, logits, points, onehot, tgt_pts_pad)


# ------------------- host-side Gale-Shapley (sequential) -------------------
# TODO(synk): Gale-Shapley is a data-dependent sequential while-loop with no
# clean Pallas equivalent; it runs on host exactly as in the reference module.

def stable_matching_algorithm(proposer_preferences, reviewer_preferences):
    num_proposers = len(proposer_preferences)
    num_reviewers = len(reviewer_preferences)
    reviewer_rankings = [[0] * num_proposers for _ in range(num_reviewers)]
    for r_id, prefs in enumerate(reviewer_preferences):
        for rank, p_id in enumerate(prefs):
            reviewer_rankings[r_id][p_id] = rank
    free_proposers = list(range(num_proposers))
    next_proposal_idx = [0] * num_proposers
    current_matches = [-1] * num_reviewers
    while free_proposers:
        proposer_id = free_proposers.pop(0)
        pref_list = proposer_preferences[proposer_id]
        if next_proposal_idx[proposer_id] >= len(pref_list):
            continue
        reviewer_id = pref_list[next_proposal_idx[proposer_id]]
        next_proposal_idx[proposer_id] += 1
        current_partner_id = current_matches[reviewer_id]
        if current_partner_id == -1:
            current_matches[reviewer_id] = proposer_id
        else:
            rank_new = reviewer_rankings[reviewer_id][proposer_id]
            rank_cur = reviewer_rankings[reviewer_id][current_partner_id]
            if rank_new < rank_cur:
                current_matches[reviewer_id] = proposer_id
                free_proposers.append(current_partner_id)
            else:
                free_proposers.append(proposer_id)
    return {p: r for r, p in enumerate(current_matches) if p != -1}


class StableMatcher:
    def __init__(self, cost_class: float = 1.0, cost_point: float = 1.0):
        assert cost_class != 0 or cost_point != 0, "all costs can't be 0"
        self.cost_class = float(cost_class)
        self.cost_point = float(cost_point)

    def _cost_blocks(self, outputs, targets):
        """Per-sample cost tiles: ((bs, nq, T_pad) numpy array or None, sizes)."""
        pred_logits = outputs['pred_logits']   # (bs, nq, num_classes)
        pred_points = outputs['pred_points']   # (bs, nq, 2)
        bs, nq = int(pred_logits.shape[0]), int(pred_logits.shape[1])
        img_h, img_w = outputs['img_shape']
        sizes = [int(np.asarray(t['points']).shape[0]) for t in targets]

        t_max = max(sizes) if sizes else 0
        if t_max == 0:
            return None, sizes                 # edge case: no targets at all

        # Host-side padding to the 128-lane bucket (done OUTSIDE jit, so only
        # the bucket size — not the raw target count — is a trace dimension).
        t_pad = _round_up(t_max, 128)
        awp = abs(self.cost_point)
        tgt_ids_pad = np.full((bs, t_pad), -1, dtype=np.int32)
        tgt_pts_pad = np.zeros((bs, 2, t_pad), dtype=np.float32)
        for i, t in enumerate(targets):
            s = sizes[i]
            if s:
                # NOTE: labels must lie in [0, num_classes); an out-of-range
                # "no-object" label would silently get zero class cost here.
                tgt_ids_pad[i, :s] = np.asarray(t['labels'], dtype=np.int32)
                tgt_pts_pad[i, :, :s] = (
                    np.asarray(t['points'], dtype=np.float32).T * awp)

        sign = 1.0 if self.cost_point >= 0 else -1.0
        params = jnp.array(
            [float(img_h) * awp, float(img_w) * awp, self.cost_class, sign],
            dtype=jnp.float32)

        C = _cost_blocks_jit(
            params,
            jnp.asarray(pred_logits, dtype=jnp.float32),
            jnp.asarray(pred_points, dtype=jnp.float32),
            jnp.asarray(tgt_ids_pad),
            jnp.asarray(tgt_pts_pad))
        return np.asarray(jax.block_until_ready(C)), sizes

    def __call__(self, outputs, targets):
        C_blocks, sizes = self._cost_blocks(outputs, targets)
        indices = []
        for i, s in enumerate(sizes):
            if s == 0 or C_blocks is None:
                indices.append((np.array([], dtype=np.int64),
                                np.array([], dtype=np.int64)))
                continue
            cost_matrix = C_blocks[i, :, :s]             # (nq, s) numpy view
            pred_prefs = np.argsort(cost_matrix, axis=1).tolist()
            target_prefs = np.argsort(cost_matrix, axis=0).T.tolist()
            matches = stable_matching_algorithm(pred_prefs, target_prefs)
            if not matches:
                indices.append((np.array([], dtype=np.int64),
                                np.array([], dtype=np.int64)))
                continue
            preds_i = np.array(list(matches.keys()), dtype=np.int64)
            targets_j = np.array(list(matches.values()), dtype=np.int64)
            indices.append((preds_i, targets_j))
        return indices


# --------------------------------- main -------------------------------------

if __name__ == "__main__":
    key = jax.random.PRNGKey(0)
    bs, num_queries, num_classes = 2, 8, 4
    img_h, img_w = 64.0, 64.0
    sizes = [3, 5]

    k1, k2, k3, k4 = jax.random.split(key, 4)
    pred_logits = jax.random.normal(k1, (bs, num_queries, num_classes),
                                    dtype=jnp.float32)
    pred_points = jax.random.uniform(k2, (bs, num_queries, 2),
                                     dtype=jnp.float32)   # normalized (y, x)

    targets = []
    tkeys = jax.random.split(k3, len(sizes))
    lkeys = jax.random.split(k4, len(sizes))
    for s, tk, lk in zip(sizes, tkeys, lkeys):
        pts = jax.random.uniform(tk, (s, 2), dtype=jnp.float32) \
              * jnp.array([img_h, img_w], dtype=jnp.float32)   # absolute coords
        labels = jax.random.randint(lk, (s,), 0, num_classes, dtype=jnp.int32)
        targets.append({'points': pts, 'labels': labels})

    outputs = {'pred_logits': pred_logits,
               'pred_points': pred_points,
               'img_shape': (img_h, img_w)}

    matcher = StableMatcher(cost_class=1.0, cost_point=1.0)
    C_blocks, out_sizes = matcher._cost_blocks(outputs, targets)  # Pallas kernel
    assert C_blocks is not None and C_blocks.shape[:2] == (bs, num_queries)
    indices = matcher(outputs, targets)

    # --- correctness check of the Pallas kernel vs. plain-JAX reference ---
    logits_flat = pred_logits.reshape(bs * num_queries, -1)
    points_flat = pred_points.reshape(bs * num_queries, 2)
    tgt_ids = jnp.concatenate([t['labels'] for t in targets])
    tgt_points = jnp.concatenate([t['points'] for t in targets])

    prob = jax.nn.softmax(logits_flat, axis=-1)
    cost_class_ref = -prob[:, tgt_ids]
    pts_abs = points_flat * jnp.array([img_h, img_w], dtype=jnp.float32)
    diff = pts_abs[:, None, :] - tgt_points[None, :, :]
    cost_point_ref = jnp.sqrt(jnp.sum(diff * diff, axis=-1))
    C_ref = np.asarray(1.0 * cost_point_ref + 1.0 * cost_class_ref)

    offs = np.concatenate([[0], np.cumsum(sizes)])
    for i, s in enumerate(sizes):
        ref_tile = C_ref[i * num_queries:(i + 1) * num_queries,
                         offs[i]:offs[i] + s]
        ker_tile = C_blocks[i, :, :s]
        assert np.allclose(ker_tile, ref_tile, rtol=1e-4, atol=1e-4), \
            "cost tile mismatch"

    # sanity: indices are valid matchings per sample
    for (pi, tj), s in zip(indices, sizes):
        assert pi.shape == tj.shape
        assert pi.shape[0] == min(num_queries, s)

    print("KERNEL_OK")
</pallas_src>

<mosaic_0001>
module attributes {stable_mosaic.version = 11 : i64} {
  func.func @_cost_kernel(%arg0: i32, %arg1: i32, %arg2: memref<4xf32, #tpu.memory_space<smem>>, %arg3: memref<1x8x4xf32, #tpu.memory_space<vmem>>, %arg4: memref<1x8x2xf32, #tpu.memory_space<vmem>>, %arg5: memref<1x4x128xf32, #tpu.memory_space<vmem>>, %arg6: memref<1x2x128xf32, #tpu.memory_space<vmem>>, %arg7: memref<1x8x128xf32, #tpu.memory_space<vmem>>) attributes {dimension_semantics = [#tpu.dimension_semantics<parallel>, #tpu.dimension_semantics<parallel>], iteration_bounds = array<i64: 2, 1>, scalar_prefetch = 0 : i64, scratch_operands = 0 : i64, tpu.core_type = #tpu.core_type<tc>, window_params = [{transform_indices = @transform_0, window_bounds = array<i64: 4>}, {transform_indices = @transform_1, window_bounds = array<i64: 1, 8, 4>}, {transform_indices = @transform_2, window_bounds = array<i64: 1, 8, 2>}, {transform_indices = @transform_3, window_bounds = array<i64: 1, 4, 128>}, {transform_indices = @transform_4, window_bounds = array<i64: 1, 2, 128>}, {transform_indices = @transform_5, window_bounds = array<i64: 1, 8, 128>}]} {
    %c0 = arith.constant 0 : index
    %0 = memref.load %arg2[%c0] : memref<4xf32, #tpu.memory_space<smem>>
    %c1 = arith.constant 1 : index
    %1 = memref.load %arg2[%c1] : memref<4xf32, #tpu.memory_space<smem>>
    %c2 = arith.constant 2 : index
    %2 = memref.load %arg2[%c2] : memref<4xf32, #tpu.memory_space<smem>>
    %c3 = arith.constant 3 : index
    %3 = memref.load %arg2[%c3] : memref<4xf32, #tpu.memory_space<smem>>
    %c0_0 = arith.constant 0 : index
    %c0_1 = arith.constant 0 : index
    %c0_2 = arith.constant 0 : index
    %4 = vector.load %arg3[%c0_0, %c0_1, %c0_2] : memref<1x8x4xf32, #tpu.memory_space<vmem>>, vector<1x8x4xf32>
    %5 = vector.shape_cast %4 : vector<1x8x4xf32> to vector<8x4xf32>
    %cst = arith.constant dense<0xFF800000> : vector<8xf32>
    %6 = vector.multi_reduction <maximumf>, %5, %cst [1] : vector<8x4xf32> to vector<8xf32>
    %7 = vector.shape_cast %6 : vector<8xf32> to vector<8x1xf32>
    %8 = vector.broadcast %7 : vector<8x1xf32> to vector<8x4xf32>
    %9 = arith.subf %5, %8 : vector<8x4xf32>
    %10 = math.exp %9 : vector<8x4xf32>
    %cst_3 = arith.constant dense<0.000000e+00> : vector<8xf32>
    %11 = vector.multi_reduction <add>, %10, %cst_3 [1] : vector<8x4xf32> to vector<8xf32>
    %12 = vector.shape_cast %11 : vector<8xf32> to vector<8x1xf32>
    %c0_4 = arith.constant 0 : index
    %c0_5 = arith.constant 0 : index
    %c0_6 = arith.constant 0 : index
    %13 = vector.load %arg5[%c0_4, %c0_5, %c0_6] : memref<1x4x128xf32, #tpu.memory_space<vmem>>, vector<1x4x128xf32>
    %14 = vector.shape_cast %13 : vector<1x4x128xf32> to vector<4x128xf32>
    %cst_7 = arith.constant dense<0.000000e+00> : vector<8x128xf32>
    %15 = tpu.matmul %10, %14, %cst_7 {dimension_numbers = #tpu.dot_dimension_numbers<[1], [0], [0], [1], [0, 0, 1, 1], [], []>} : vector<8x4xf32>, vector<4x128xf32>, vector<8x128xf32> -> vector<8x128xf32>
    %16 = tpu.reciprocal %12 : vector<8x1xf32> -> vector<8x1xf32>
    %17 = vector.broadcast %2 : f32 to vector<8x1xf32>
    %18 = arith.mulf %17, %16 : vector<8x1xf32>
    %cst_8 = arith.constant 0.000000e+00 : f32
    %19 = vector.broadcast %cst_8 : f32 to vector<8x1xf32>
    %20 = arith.subf %19, %18 : vector<8x1xf32>
    %21 = vector.broadcast %20 : vector<8x1xf32> to vector<8x128xf32>
    %22 = arith.mulf %21, %15 : vector<8x128xf32>
    %c0_9 = arith.constant 0 : index
    %c0_10 = arith.constant 0 : index
    %c0_11 = arith.constant 0 : index
    %23 = vector.load %arg4[%c0_9, %c0_10, %c0_11] : memref<1x8x2xf32, #tpu.memory_space<vmem>>, vector<1x8x2xf32>
    %24 = vector.shape_cast %23 : vector<1x8x2xf32> to vector<8x2xf32>
    %c0_12 = arith.constant 0 : index
    %c0_13 = arith.constant 0 : index
    %c0_14 = arith.constant 0 : index
    %25 = vector.load %arg6[%c0_12, %c0_13, %c0_14] : memref<1x2x128xf32, #tpu.memory_space<vmem>>, vector<1x2x128xf32>
    %26 = vector.shape_cast %25 : vector<1x2x128xf32> to vector<2x128xf32>
    %27 = vector.extract_strided_slice %24 {offsets = [0, 0], sizes = [8, 1], strides = [1, 1]} : vector<8x2xf32> to vector<8x1xf32>
    %28 = vector.broadcast %0 : f32 to vector<8x1xf32>
    %29 = arith.mulf %27, %28 : vector<8x1xf32>
    %30 = vector.extract_strided_slice %26 {offsets = [0, 0], sizes = [1, 128], strides = [1, 1]} : vector<2x128xf32> to vector<1x128xf32>
    %31 = vector.broadcast %29 : vector<8x1xf32> to vector<8x128xf32>
    %32 = vector.broadcast %30 : vector<1x128xf32> to vector<8x128xf32>
    %33 = arith.subf %31, %32 : vector<8x128xf32>
    %34 = vector.extract_strided_slice %24 {offsets = [0, 1], sizes = [8, 1], strides = [1, 1]} : vector<8x2xf32> to vector<8x1xf32>
    %35 = vector.broadcast %1 : f32 to vector<8x1xf32>
    %36 = arith.mulf %34, %35 : vector<8x1xf32>
    %37 = vector.extract_strided_slice %26 {offsets = [1, 0], sizes = [1, 128], strides = [1, 1]} : vector<2x128xf32> to vector<1x128xf32>
    %38 = vector.broadcast %36 : vector<8x1xf32> to vector<8x128xf32>
    %39 = vector.broadcast %37 : vector<1x128xf32> to vector<8x128xf32>
    %40 = arith.subf %38, %39 : vector<8x128xf32>
    %41 = arith.mulf %33, %33 : vector<8x128xf32>
    %42 = arith.mulf %40, %40 : vector<8x128xf32>
    %43 = arith.addf %41, %42 : vector<8x128xf32>
    %44 = math.sqrt %43 : vector<8x128xf32>
    %cst_15 = arith.constant 0.000000e+00 : f32
    %45 = arith.cmpf oge, %3, %cst_15 : f32
    %46 = arith.extui %45 : i1 to i32
    %c0_i32 = arith.constant 0 : i32
    %47 = arith.cmpi ne, %46, %c0_i32 : i32
    scf.if %47 {
      %51 = arith.addf %44, %22 : vector<8x128xf32>
      %c0_18 = arith.constant 0 : index
      %c0_19 = arith.constant 0 : index
      %c0_20 = arith.constant 0 : index
      %52 = vector.load %arg7[%c0_18, %c0_19, %c0_20] : memref<1x8x128xf32, #tpu.memory_space<vmem>>, vector<1x8x128xf32>
      %53 = vector.shape_cast %52 : vector<1x8x128xf32> to vector<8x128xf32>
      %54 = vector.shape_cast %51 : vector<8x128xf32> to vector<1x8x128xf32>
      tpu.vector_store %arg7[%c0_18, %c0_19, %c0_20], %54 {strides = array<i32>} : memref<1x8x128xf32, #tpu.memory_space<vmem>>, vector<1x8x128xf32>,
    } else {
    }
    %cst_16 = arith.constant 0.000000e+00 : f32
    %48 = arith.cmpf olt, %3, %cst_16 : f32
    %49 = arith.extui %48 : i1 to i32
    %c0_i32_17 = arith.constant 0 : i32
    %50 = arith.cmpi ne, %49, %c0_i32_17 : i32
    scf.if %50 {
      %51 = arith.subf %22, %44 : vector<8x128xf32>
      %c0_18 = arith.constant 0 : index
      %c0_19 = arith.constant 0 : index
      %c0_20 = arith.constant 0 : index
      %52 = vector.load %arg7[%c0_18, %c0_19, %c0_20] : memref<1x8x128xf32, #tpu.memory_space<vmem>>, vector<1x8x128xf32>
      %53 = vector.shape_cast %52 : vector<1x8x128xf32> to vector<8x128xf32>
      %54 = vector.shape_cast %51 : vector<8x128xf32> to vector<1x8x128xf32>
      tpu.vector_store %arg7[%c0_18, %c0_19, %c0_20], %54 {strides = array<i32>} : memref<1x8x128xf32, #tpu.memory_space<vmem>>, vector<1x8x128xf32>,
    } else {
    }
    return
  }
  func.func @transform_0(%arg0: i32, %arg1: i32) -> i32 {
    %c0_i32 = arith.constant 0 : i32
    %c0_i32_0 = arith.constant 0 : i32
    return %c0_i32 : i32
  }
  func.func @transform_1(%arg0: i32, %arg1: i32) -> (i32, i32, i32) {
    %c0_i32 = arith.constant 0 : i32
    %c0_i32_0 = arith.constant 0 : i32
    return %arg0, %arg1, %c0_i32 : i32, i32, i32
  }
  func.func @transform_2(%arg0: i32, %arg1: i32) -> (i32, i32, i32) {
    %c0_i32 = arith.constant 0 : i32
    %c0_i32_0 = arith.constant 0 : i32
    return %arg0, %arg1, %c0_i32 : i32, i32, i32
  }
  func.func @transform_3(%arg0: i32, %arg1: i32) -> (i32, i32, i32) {
    %c0_i32 = arith.constant 0 : i32
    %c0_i32_0 = arith.constant 0 : i32
    %c0_i32_1 = arith.constant 0 : i32
    return %arg0, %c0_i32, %c0_i32_0 : i32, i32, i32
  }
  func.func @transform_4(%arg0: i32, %arg1: i32) -> (i32, i32, i32) {
    %c0_i32 = arith.constant 0 : i32
    %c0_i32_0 = arith.constant 0 : i32
    %c0_i32_1 = arith.constant 0 : i32
    return %arg0, %c0_i32, %c0_i32_0 : i32, i32, i32
  }
  func.func @transform_5(%arg0: i32, %arg1: i32) -> (i32, i32, i32) {
    %c0_i32 = arith.constant 0 : i32
    %c0_i32_0 = arith.constant 0 : i32
    return %arg0, %arg1, %c0_i32 : i32, i32, i32
  }
}

</mosaic_0001>

<bundles_post_ra>
// kernel: _cost_blocks_jit.1
= control target key start
LH: loop header
LB: loop body
LE: loop exit
PB: predicated region body
PF: predicated region fallthrough
CT: control target
= control target key end

     0   :  { %10 = vsyncpa [#allocation4], 0  ;;  %s988_s0 = inlined_call_operand.vmem [shape: f32[4], index: 0, kind: input, shape index: {}]   ;;  %s989_s1 = inlined_call_operand.vmem [shape: f32[2,8,4], index: 1, kind: input, shape index: {}]   ;;  %s990_s2 = inlined_call_operand.vmem [shape: f32[2,8,2], index: 2, kind: input, shape index: {}]   ;;  %s991_s3 = inlined_call_operand.vmem [shape: f32[2,4,128], index: 3, kind: input, shape index: {}]   ;;  %s992_s4 = inlined_call_operand.vmem [shape: f32[2,2,128], index: 4, kind: input, shape index: {}]   ;;  %s993_s5 = inlined_call_operand.hbm [shape: f32[2,8,128], index: 5, kind: output, shape index: {}]  }
   0x1   :  { %11 = vsyncpa [#allocation3], 0 }
   0x2   :  { %13 = vsyncpa [#allocation3 + $0x1], 0  ;;  %s844_s18 = smov 0   ;;  %s846_s19 = smov 0  }
   0x3   :  { %s848_s20 = smov 0   ;;  %s850_s21 = smov 0  }
   0x4   :  { %s852_s22 = smov 0   ;;  %s854_s23 = smov 0  }
   0x5 LB: > { %s604_s24 = sadd.s32 4294967295, %s806_s23   ;;  %s605_s25 = sadd.s32 4294967294, %s806_s23   ;;  %s806_s23 = sphi %s854_s23, %s19_s23   ;;  %s802_s22 = sphi %s852_s22, %s1002_s22   ;;  %s798_s21 = sphi %s850_s21, %s1001_s21   ;;  %s794_s20 = sphi %s848_s20, %s1000_s20   ;;  %s790_s19 = sphi %s846_s19, %s999_s19   ;;  %s786_s18 = sphi %s844_s18, %s998_s18  }
   0x6   : > { %s31_s26 = sadd.s32 1, %s802_s22  ;;  %s169_s27 = sadd.s32 1, %s794_s20 }
   0x7   : > { %p33_p0 = scmp.ge.s32.totalorder %s31_s26, 2  ;;  %p179_p1 = scmp.ne.s32.totalorder %s794_s20, %s790_s19 }
   0x8   : > { %p180_p2 = scmp.eq.s32.totalorder %s604_s24, 1  ;;  %p185_p3 = scmp.ne.s32.totalorder %s790_s19, %s786_s18 }
   0x9   : > { %s1004_s26 = smov (%p33_p0, %s31_s26), 0  ;;  %p186_p5 = scmp.eq.s32.totalorder %s605_s25, 1 }
   0xa   : > { %p884_p4 = por %p180_p2, %p179_p1  ;;  %s164_s29 = ssub.s32 %s802_s22, %s1004_s26 }
   0xb   : > { %p606_p6 = scmp.ge.s32.totalorder %s806_s23, 1  ;;  %p167_p7 = scmp.eq.s32.totalorder %s164_s29, 0 }
   0xc   : > { %p891_p8 = por %p186_p5, %p185_p3  ;;  %p193_p9 = scmp.lt.s32.totalorder %s806_s23, 3 }
   0xd   : > { %s897_s6 = scalar_select %p167_p7, %s794_s20, %s169_s27  }
   0xe   : > { %p899_p10 = pnand %p606_p6, %p193_p9  ;;  %p903_p11 = scmp.eq.s32.totalorder %s604_s24, 0 }
   0xf   : > { %s206_s11 = sshll.u32 %s988_s0, 4  ;;  %s207_s11 = int_to_ptr.vmem [resolvable:$true] %s206_s11 }
  0x10   : > { %p638_p12 = pneg %p899_p10  ;;  %s711_s12 = scalar_lea.vmem %s207_s11, 16 }
  0x11   : > { %p712_p0 = scmp.ne.s32.totalorder %s207_s11, %s711_s12  ;;  %p719_p5 = scmp.lt.s32.totalorder %s207_s11, %s207_s11 }
  0x12   : > { %p639_p13 = pnand %p903_p11, %p638_p12  ;;  %p720_p6 = scmp.lt.s32.totalorder %s711_s12, %s711_s12 }
  0x14   : > { %p713_p1 = pneg %p639_p13  ;;  %p721_p7 = por %p720_p6, %p719_p5 }
  0x16   : > { %p714_p2 = pnand %p713_p1, %p712_p0 }
  0x18   : > { %p715_p3 = pneg %p714_p2 }
  0x1a   : > { %p722_p9 = pnand %p721_p7, %p715_p3 }
  0x1c   : > { %725 = shalt.err (!%p722_p9)
}
  0x1d   : > { %s808_s13 = smov [#allocation2]   ;;  %253 = sbr.rel (%p899_p10) target bundleno = 429 (0x1ad), region = 40 }
  0x1e   : > { %641 = dma.vmem_to_smem (!%p639_p13), %s207_s11, 16, %s808_s13, [#allocation4]  }
  0x22   : > { %777 = dma.done.wait (%p903_p11), [#allocation4], 16  }
  0x23   : > { %779 = vsyncadd (%p903_p11), [#allocation4], 4294967280 }
  0x24   : > { %259 = sfence }
  0x25   : > { %p299_p12 = scmp.lt.s32.totalorder %s798_s21, 1  ;;  %vm326_vm0 = vcmask 31744   ;;  %s296_s25 = sand.u32 1, %s790_s19   ;;  %v809_v2 = vmov 0.0   ;;  %vm340_vm1 = vcmask 1043456   ;;  %vm810_vm2 = vmmov 0  }
  0x26   : > { %s932_s27 = sshll.u32 %s296_s25, 3  ;;  %627 = vmatprep.subr.mxu0 %v809_v2  ;;  %629 = vmatprep.mubr.msk.f32.mxu0 %vm810_vm2, %v809_v2  ;;  %s321_s10 = sld [smem:[#allocation2]]  ;;  %v811_v4 = vmov 0   ;;  %v812_v5 = vmov 1   ;;  %v428_v16 = vlaneseq }
  0x27   : > { %s922_s14 = scalar_select %p299_p12, %s798_s21, 1  ;;  %702 = vset.pattern.permute.xlu1 %v811_v4  ;;  %704 = vset.pattern.permute.xlu0 %v812_v5 }
  0x28   : > { %s616_s16 = sld [smem:[#allocation2 + $0x1]]  ;;  %v429_v18 = vshrl.u32 %v428_v16, 7  ;;  %s298_s8 = scalar_lea.vmem [#allocation5], %s932_s27 }
  0x29   : > { %s612_s15 = sshll.u32 %s922_s14, 3  ;;  %s614_s29 = sshll.u32 %s922_s14, 2 }
  0x2a   : > { %s305_s24 = scalar_lea.vmem %s989_s1, %s612_s15  ;;  %s316_s9 = scalar_lea.vmem %s991_s3, %s614_s29  ;;  %v430_v20 = vsub.s32 0, %v429_v18  ;;  %v442_v21 = vsub.s32 1, %v429_v18 }
  0x2b   : > { %v325_v0 = vld [vmem:[%s305_s24] sm:$0xff]  ;;  %s312_s13 = scalar_lea.vmem %s990_s2, %s612_s15  ;;  %s615_s15 = sshll.u32 %s922_s14, 1 }
  0x2c   : > { %v327_v1 = vsel %vm326_vm0, %v325_v0, -inf  ;;  %v336_v3 = vld [vmem:[%s316_s9] sm:$0xf]  ;;  %v421_v7 = vstv %s321_s10  ;;  %s320_s29 = scalar_lea.vmem %s992_s4, %s615_s15  ;;  %s618_s14 = sld [smem:[#allocation2 + $0x3]] }
  0x2d   : > { %328 = vmax.xlane.f32.xlu0 %v327_v1  ;;  %628 = vmatpush3.msk.msra.mxu0 %vm340_vm1, %v336_v3  ;;  %v419_v6 = vld [vmem:[%s312_s13] sm:$0xff]  ;;  %s617_s7 = sld [smem:[#allocation2 + $0x2]] }
  0x2e   : > { %v422_v8 = vmul.f32 %v421_v7, %v419_v6  ;;  %v433_v9 = vstv %s616_s16  ;;  %v420_v19 = vld [vmem:[%s320_s29] sm:$0x3] }
  0x2f   : > { %v434_v10 = vmul.f32 %v433_v9, %v419_v6  ;;  %v431_v23 = vrot.slane %v420_v19, %v430_v20  ;;  %v443_v24 = vrot.slane %v420_v19, %v442_v21 }
  0x30   : > { %425 = vperm.xlu1 %702, %v422_v8  }
  0x32   : > { %p455_p10 = scmp.ge.f32.partialorder %s618_s14, 0.0 }
  0x33   : > { %v415_v37 = vstv %s617_s7 }
  0x34   : > { %703 = vset.pattern.permute.xlu1 %v812_v5 }
  0x35   : > { %437 = vperm.xlu1 %703, %v434_v10  }
  0xab   : > { %v426_v17 = vpop.permute.xlu1 %425 }
  0xac   : > { %v432_v25 = vsub.f32 %v426_v17, %v431_v23 }
  0xae   : > { %v445_v27 = vmul.f32 %v432_v25, %v432_v25 }
  0xb0   : > { %v438_v22 = vpop.permute.xlu1 %437 }
  0xb1   : > { %v444_v26 = vsub.f32 %v438_v22, %v443_v24 }
  0xb3   : > { %v446_v28 = vmul.f32 %v444_v26, %v444_v26 }
  0xb5   : > { %v447_v29 = vadd.f32 %v446_v28, %v445_v27 }
  0xb6   : > { %v329_v11 = vpop.xlane.xlu0 %328 }
  0xb7   : > { %v330_v12 = vsub.f32 %v325_v0, %v329_v11  ;;  %vm450_vm3 = vcmp.eq.f32.partialorder %v447_v29, inf  ;;  %v453_v31 = vand.u32 2147483648, %v447_v29  ;;  %vm452_vm4 = vcmp.eq.f32.partialorder %v447_v29, 0.0 }
  0xb9   : > { %v331_v13 = vmul.f32 1.442695, %v330_v12 }
  0xbb   : > { %705 = vpow2.f32 %v331_v13 }
  0xbc   : > { %707 = vrsqrt.f32 %v447_v29 }
  0xc8   : > { %v706_v14 = vpop.eup %705 }
  0xc9   : > { %630 = vmatmul.mubr.msk.f32.vlgmr.msra.gmra.mxu0 %vm326_vm0, %v706_v14  ;;  %v333_v15 = vsel %vm326_vm0, %v706_v14, 0.0  ;;  %v708_v30 = vpop.eup %707 }
  0xca   : > { %334 = vadd.xlane.f32.xlu0 %v333_v15  ;;  %v449_v32 = vmul.f32 %v708_v30, %v447_v29 }
  0xcc   : > { %v451_v33 = vsel %vm450_vm3, %v447_v29, %v449_v32 }
  0xcd   : > { %v454_v34 = vsel %vm452_vm4, %v453_v31, %v451_v33 }
 0x153   : > { %v335_v35 = vpop.xlane.xlu0 %334 }
 0x154   : > { %709 = vrcp.f32 %v335_v35 }
 0x161   : > { %v710_v36 = vpop.eup %709 }
 0x162   : > { %v416_v38 = vmul.f32 %v710_v36, %v415_v37 }
 0x164   : > { %v417_v39 = vsub.f32 0.0, %v416_v38 }
 0x187   : > { %458 = sbr.rel (!%p455_p10) target bundleno = 399 (0x18f), region = 48 }
 0x189   : > { %v410_v40 = vpop.f32.mrf.mxu0 }
 0x18a   : > { %v418_v41 = vmul.f32 %v417_v39, %v410_v40 }
 0x18b   : > { %v631_v42 = vpop.f32.mrf.mxu0 }
 0x18c   : > { %v459_v43 = vadd.f32 %v454_v34, %v418_v41 }
 0x18e   : > { %460 = vst [vmem:[%s298_s8] sm:$0xff] %v459_v43 }
 0x18f PF: > { %p461_p11 = scmp.lt.f32.partialorder %s618_s14, 0.0 }
 0x190   : > { %v465_v44 = vsub.f32 (%p461_p11), %v418_v41, %v454_v34 }
 0x191   : > { %464 = sbr.rel (!%p461_p11) target bundleno = 406 (0x196), region = 52 }
 0x192   : > { %466 = vst [vmem:[%s298_s8] sm:$0xff] (%p461_p11), %v465_v44 }
 0x196 PF: > { %s622_s9 = sshll.u32 %s798_s21, 7  ;;  %s482_s13 = sshll.u32 %s298_s8, 4  ;;  %s483_s13 = int_to_ptr.vmem [resolvable:$true] %s482_s13 }
 0x197   : > { %s480_s12 = scalar_lea.hbm %s993_s5, %s622_s9  ;;  %s468_s27 = scalar_lea.sflag [#allocation3], %s296_s25 }
 0x198   : > { %s726_s16 = scalar_lea.vmem %s483_s13, 128  ;;  %s813_s15 = smov [#allocation5]  }
 0x199   : > { %p727_p13 = scmp.ne.s32.totalorder %s483_s13, %s726_s16  ;;  %s730_s17 = sshll.u32 %s813_s15, 4  ;;  %s731_s17 = int_to_ptr.vmem [resolvable:$false] %s730_s17 }
 0x19a   : > { %s732_s24 = scalar_lea.vmem %s731_s17, 256  ;;  %p733_p2 = scmp.lt.s32.totalorder %s483_s13, %s731_s17 }
 0x19b   : > { %p728_p0 = pnand %p727_p13, %p884_p4  ;;  %p734_p3 = scmp.lt.s32.totalorder %s732_s24, %s726_s16 }
 0x19d   : > { %p729_p1 = pneg %p728_p0  ;;  %p735_p5 = por %p734_p3, %p733_p2 }
 0x19f   : > { %p736_p6 = pnand %p735_p5, %p729_p1 }
 0x1a1   : > { %739 = shalt.err (!%p736_p6)
}
 0x1a2   : > { %s740_s21 = scalar_lea.hbm %s480_s12, 128  ;;  %s744_s14 = scalar_lea.hbm %s993_s5, 256 }
 0x1a3   : > { %p741_p7 = scmp.ne.s32.totalorder %s480_s12, %s740_s21  ;;  %p745_p10 = scmp.lt.s32.totalorder %s480_s12, %s993_s5 }
 0x1a4   : > { %p746_p11 = scmp.lt.s32.totalorder %s744_s14, %s740_s21 }
 0x1a5   : > { %p742_p9 = pnand %p741_p7, %p884_p4 }
 0x1a6   : > { %p747_p13 = por %p746_p11, %p745_p10 }
 0x1a7   : > { %p743_p12 = pneg %p742_p9 }
 0x1a9   : > { %p748_p0 = pnand %p747_p13, %p743_p12 }
 0x1ab   : > { %751 = shalt.err (!%p748_p0)
}
 0x1ac   : > { %636 = dma.vmem_to_hbm [thread:$0]  (%p884_p4), %s483_s13, 128, %s480_s12, %s468_s27  }
 0x1ad PF: > { %p648_p1 = scmp.ge.s32.totalorder %s806_s23, 2  ;;  %s494_s9 = sand.u32 1, %s786_s18  }
 0x1ae   : > { %s495_s10 = scalar_lea.sflag [#allocation3], %s494_s9 }
 0x1af   : > { %p643_p2 = pnand %p648_p1, %p891_p8 }
 0x1b1   : > { %p644_p3 = pneg %p643_p2 }
 0x1b3   : > { %781 = dma.done.wait (%p644_p3), %s495_s10, 128  }
 0x1b4   : > { %783 = vsyncadd (%p644_p3), %s495_s10, 4294967168  ;;  %s19_s23 = sadd.s32 1, %s806_s23   ;;  %s998_s18 = smov %s790_s19 }
 0x1b5   : > { %p16_p5 = scmp.ge.s32.totalorder %s19_s23, 4   ;;  %s999_s19 = smov %s794_s20 }
 0x1b6   : > { %s1000_s20 = smov %s897_s6  ;;  %s1001_s21 = smov %s802_s22 }
 0x1b7   : > { %s1002_s22 = smov %s1004_s26  ;;  %18 = sbr.rel (!%p16_p5) target bundleno = 5 (0x5), region = 97 }
 0x1bc   :  { %500 = vsyncpa [#allocation3], 1 }
 0x1bd   :  { %502 = vsyncpa [#allocation3 + $0x1], 1 }
 0x1be   :  { %503 = vsyncpa [#allocation4], 1 }
 0x1bf   :  { %505 = vsyncpa [#allocation4 + $0x1], 1 }

</bundles_post_ra>
